<compile_context>
chip_gen: v6e
topology: v6e:2x2x1
jax: 0.10.0
libtpu: 0.0.40
codegen_flags: <defaults>
</compile_context>

<pallas_src>
import functools

import jax
import jax.numpy as jnp
from jax.experimental import pallas as pl
from jax.experimental.pallas import tpu as pltpu

HIDDEN1 = 400
HIDDEN2 = 300

LANE = 128      # vreg lane width
SUBLANE = 8     # f32 sublane height

H1_PAD = 512    # 400 -> 512
H2_PAD = 384    # 300 -> 384


def _round_up(n, m):
    return ((n + m - 1) // m) * m


def actor_kernel(x_ref, w1_ref, b1_ref, w2_ref, b2_ref, w3_ref, b3_ref, out_ref):
    # Activations are cast to bf16 for the MXU; accumulation stays f32.
    x = x_ref[...].astype(jnp.bfloat16)

    # Layer 1: Linear(state -> 512 padded) + ReLU
    h1 = jnp.dot(x, w1_ref[...], preferred_element_type=jnp.float32) + b1_ref[...]
    h1 = jnp.maximum(h1, 0.0).astype(jnp.bfloat16)

    # Layer 2: Linear(512 -> 384 padded) + ReLU
    h2 = jnp.dot(h1, w2_ref[...], preferred_element_type=jnp.float32) + b2_ref[...]
    h2 = jnp.maximum(h2, 0.0).astype(jnp.bfloat16)

    # Layer 3: Linear(384 -> action padded) + tanh (tanh -> EUP)
    a = jnp.dot(h2, w3_ref[...], preferred_element_type=jnp.float32) + b3_ref[...]
    out_ref[...] = jnp.tanh(a)


@jax.jit
def actor_forward(estado, params):
    """estado: (B, state_dim) f32. params: dict of w1,b1,w2,b2,w3,b3 (unpadded)."""
    B, state_dim = estado.shape
    action_dim = params["w3"].shape[1]

    din_pad = _round_up(max(state_dim, LANE), LANE)
    dout_pad = _round_up(max(action_dim, LANE), LANE)

    # Batch tile: 256 rows for large batches (full MXU passes, long grid),
    # otherwise just the sublane-padded batch (single grid step).
    if B >= 256:
        tb = 256
    else:
        tb = _round_up(max(B, SUBLANE), SUBLANE)
    b_pad = _round_up(B, tb)
    n_tiles = b_pad // tb

    # Zero-pad everything to lane/sublane-aligned shapes; weights in bf16.
    x_p = jnp.pad(estado, ((0, b_pad - B), (0, din_pad - state_dim)))
    w1 = jnp.pad(params["w1"], ((0, din_pad - state_dim), (0, H1_PAD - HIDDEN1))).astype(jnp.bfloat16)
    b1 = jnp.pad(params["b1"], ((0, 0), (0, H1_PAD - HIDDEN1)))
    w2 = jnp.pad(params["w2"], ((0, H1_PAD - HIDDEN1), (0, H2_PAD - HIDDEN2))).astype(jnp.bfloat16)
    b2 = jnp.pad(params["b2"], ((0, 0), (0, H2_PAD - HIDDEN2)))
    w3 = jnp.pad(params["w3"], ((0, H2_PAD - HIDDEN2), (0, dout_pad - action_dim))).astype(jnp.bfloat16)
    b3 = jnp.pad(params["b3"], ((0, 0), (0, dout_pad - action_dim)))

    flops = 2 * b_pad * (din_pad * H1_PAD + H1_PAD * H2_PAD + H2_PAD * dout_pad)
    bytes_accessed = (
        x_p.size * 4
        + (w1.size + w2.size + w3.size) * 2
        + (b1.size + b2.size + b3.size) * 4
        + b_pad * dout_pad * 4
    )
    cost = pl.CostEstimate(
        flops=flops, transcendentals=b_pad * dout_pad, bytes_accessed=bytes_accessed
    )

    out_p = pl.pallas_call(
        actor_kernel,
        out_shape=jax.ShapeDtypeStruct((b_pad, dout_pad), jnp.float32),
        grid=(n_tiles,),
        in_specs=[
            pl.BlockSpec((tb, din_pad), lambda i: (i, 0)),          # x: tiled over batch
            pl.BlockSpec((din_pad, H1_PAD), lambda i: (0, 0)),      # weights/biases resident
            pl.BlockSpec((1, H1_PAD), lambda i: (0, 0)),
            pl.BlockSpec((H1_PAD, H2_PAD), lambda i: (0, 0)),
            pl.BlockSpec((1, H2_PAD), lambda i: (0, 0)),
            pl.BlockSpec((H2_PAD, dout_pad), lambda i: (0, 0)),
            pl.BlockSpec((1, dout_pad), lambda i: (0, 0)),
        ],
        out_specs=pl.BlockSpec((tb, dout_pad), lambda i: (i, 0)),
        compiler_params=pltpu.CompilerParams(
            dimension_semantics=("parallel",),  # batch tiles shard across TCs (v7x)
        ),
        cost_estimate=cost,
    )(x_p, w1, b1, w2, b2, w3, b3)

    # Strip batch / action padding.
    return out_p[:B, :action_dim]


def init_actor_params(key, state_dim, action_dim):
    """PyTorch-Linear-style uniform(-1/sqrt(fan_in), +1/sqrt(fan_in)) init (unpadded)."""
    ks = jax.random.split(key, 6)

    def linear(kw, kb, fan_in, fan_out):
        bound = 1.0 / jnp.sqrt(jnp.float32(fan_in))
        w = jax.random.uniform(kw, (fan_in, fan_out), jnp.float32, -bound, bound)
        b = jax.random.uniform(kb, (1, fan_out), jnp.float32, -bound, bound)
        return w, b

    w1, b1 = linear(ks[0], ks[1], state_dim, HIDDEN1)
    w2, b2 = linear(ks[2], ks[3], HIDDEN1, HIDDEN2)
    w3, b3 = linear(ks[4], ks[5], HIDDEN2, action_dim)
    return {"w1": w1, "b1": b1, "w2": w2, "b2": b2, "w3": w3, "b3": b3}


if __name__ == "__main__":
    key = jax.random.PRNGKey(0)
    k_params, k_x = jax.random.split(key)

    batch = 2
    state_dim = 8      # dimension_estados
    action_dim = 4     # dimension_acciones

    params = init_actor_params(k_params, state_dim, action_dim)
    estado = jax.random.normal(k_x, (batch, state_dim), jnp.float32)

    accion = actor_forward(estado, params)
    accion = jax.block_until_ready(accion)

    # Sanity check against plain-JAX f32 reference of the same math.
    # (Kernel uses bf16 MXU operands with f32 accumulation -> small tolerance.)
    ref = jnp.maximum(estado @ params["w1"] + params["b1"], 0.0)
    ref = jnp.maximum(ref @ params["w2"] + params["b2"], 0.0)
    ref = jnp.tanh(ref @ params["w3"] + params["b3"])
    assert accion.shape == (batch, action_dim)
    assert jnp.allclose(accion, ref, atol=2e-2), "mismatch vs reference"

    print("KERNEL_OK")
</pallas_src>

<mosaic_0001>
module attributes {stable_mosaic.version = 11 : i64} {
  func.func @actor_kernel(%arg0: i32, %arg1: memref<8x128xf32, #tpu.memory_space<vmem>>, %arg2: memref<128x512xbf16, #tpu.memory_space<vmem>>, %arg3: memref<1x512xf32, #tpu.memory_space<vmem>>, %arg4: memref<512x384xbf16, #tpu.memory_space<vmem>>, %arg5: memref<1x384xf32, #tpu.memory_space<vmem>>, %arg6: memref<384x128xbf16, #tpu.memory_space<vmem>>, %arg7: memref<1x128xf32, #tpu.memory_space<vmem>>, %arg8: memref<8x128xf32, #tpu.memory_space<vmem>>) attributes {dimension_semantics = [#tpu.dimension_semantics<parallel>], iteration_bounds = array<i64: 1>, scalar_prefetch = 0 : i64, scratch_operands = 0 : i64, tpu.core_type = #tpu.core_type<tc>, window_params = [{transform_indices = @transform_0, window_bounds = array<i64: 8, 128>}, {pipeline_mode = #tpu.pipeline_mode<synchronous>, transform_indices = @transform_1, window_bounds = array<i64: 128, 512>}, {pipeline_mode = #tpu.pipeline_mode<synchronous>, transform_indices = @transform_2, window_bounds = array<i64: 1, 512>}, {pipeline_mode = #tpu.pipeline_mode<synchronous>, transform_indices = @transform_3, window_bounds = array<i64: 512, 384>}, {pipeline_mode = #tpu.pipeline_mode<synchronous>, transform_indices = @transform_4, window_bounds = array<i64: 1, 384>}, {pipeline_mode = #tpu.pipeline_mode<synchronous>, transform_indices = @transform_5, window_bounds = array<i64: 384, 128>}, {pipeline_mode = #tpu.pipeline_mode<synchronous>, transform_indices = @transform_6, window_bounds = array<i64: 1, 128>}, {transform_indices = @transform_7, window_bounds = array<i64: 8, 128>}]} {
    %c0 = arith.constant 0 : index
    %c0_0 = arith.constant 0 : index
    %0 = vector.load %arg1[%c0, %c0_0] : memref<8x128xf32, #tpu.memory_space<vmem>>, vector<8x128xf32>
    %1 = arith.truncf %0 : vector<8x128xf32> to vector<8x128xbf16>
    %c0_1 = arith.constant 0 : index
    %c0_2 = arith.constant 0 : index
    %2 = vector.load %arg2[%c0_1, %c0_2] : memref<128x512xbf16, #tpu.memory_space<vmem>>, vector<128x512xbf16>
    %cst = arith.constant dense<0.000000e+00> : vector<8x512xf32>
    %3 = tpu.matmul %1, %2, %cst {dimension_numbers = #tpu.dot_dimension_numbers<[1], [0], [0], [1], [0, 0, 1, 1], [], []>} : vector<8x128xbf16>, vector<128x512xbf16>, vector<8x512xf32> -> vector<8x512xf32>
    %c0_3 = arith.constant 0 : index
    %c0_4 = arith.constant 0 : index
    %4 = vector.load %arg3[%c0_3, %c0_4] : memref<1x512xf32, #tpu.memory_space<vmem>>, vector<1x512xf32>
    %5 = vector.broadcast %4 : vector<1x512xf32> to vector<8x512xf32>
    %6 = arith.addf %3, %5 : vector<8x512xf32>
    %cst_5 = arith.constant 0.000000e+00 : f32
    %7 = vector.broadcast %cst_5 : f32 to vector<8x512xf32>
    %8 = arith.maximumf %6, %7 : vector<8x512xf32>
    %9 = arith.truncf %8 : vector<8x512xf32> to vector<8x512xbf16>
    %c0_6 = arith.constant 0 : index
    %c0_7 = arith.constant 0 : index
    %10 = vector.load %arg4[%c0_6, %c0_7] : memref<512x384xbf16, #tpu.memory_space<vmem>>, vector<512x384xbf16>
    %cst_8 = arith.constant dense<0.000000e+00> : vector<8x384xf32>
    %11 = tpu.matmul %9, %10, %cst_8 {dimension_numbers = #tpu.dot_dimension_numbers<[1], [0], [0], [1], [0, 0, 1, 1], [], []>} : vector<8x512xbf16>, vector<512x384xbf16>, vector<8x384xf32> -> vector<8x384xf32>
    %c0_9 = arith.constant 0 : index
    %c0_10 = arith.constant 0 : index
    %12 = vector.load %arg5[%c0_9, %c0_10] : memref<1x384xf32, #tpu.memory_space<vmem>>, vector<1x384xf32>
    %13 = vector.broadcast %12 : vector<1x384xf32> to vector<8x384xf32>
    %14 = arith.addf %11, %13 : vector<8x384xf32>
    %cst_11 = arith.constant 0.000000e+00 : f32
    %15 = vector.broadcast %cst_11 : f32 to vector<8x384xf32>
    %16 = arith.maximumf %14, %15 : vector<8x384xf32>
    %17 = arith.truncf %16 : vector<8x384xf32> to vector<8x384xbf16>
    %c0_12 = arith.constant 0 : index
    %c0_13 = arith.constant 0 : index
    %18 = vector.load %arg6[%c0_12, %c0_13] : memref<384x128xbf16, #tpu.memory_space<vmem>>, vector<384x128xbf16>
    %cst_14 = arith.constant dense<0.000000e+00> : vector<8x128xf32>
    %19 = tpu.matmul %17, %18, %cst_14 {dimension_numbers = #tpu.dot_dimension_numbers<[1], [0], [0], [1], [0, 0, 1, 1], [], []>} : vector<8x384xbf16>, vector<384x128xbf16>, vector<8x128xf32> -> vector<8x128xf32>
    %c0_15 = arith.constant 0 : index
    %c0_16 = arith.constant 0 : index
    %20 = vector.load %arg7[%c0_15, %c0_16] : memref<1x128xf32, #tpu.memory_space<vmem>>, vector<1x128xf32>
    %21 = vector.broadcast %20 : vector<1x128xf32> to vector<8x128xf32>
    %22 = arith.addf %19, %21 : vector<8x128xf32>
    %23 = math.tanh %22 : vector<8x128xf32>
    %c0_17 = arith.constant 0 : index
    %c0_18 = arith.constant 0 : index
    %24 = vector.load %arg8[%c0_17, %c0_18] : memref<8x128xf32, #tpu.memory_space<vmem>>, vector<8x128xf32>
    tpu.vector_store %arg8[%c0_17, %c0_18], %23 {strides = array<i32>} : memref<8x128xf32, #tpu.memory_space<vmem>>, vector<8x128xf32>,
    return
  }
  func.func @transform_0(%arg0: i32) -> (i32, i32) {
    %c0_i32 = arith.constant 0 : i32
    %c0_i32_0 = arith.constant 0 : i32
    return %arg0, %c0_i32 : i32, i32
  }
  func.func @transform_1(%arg0: i32) -> (i32, i32) {
    %c0_i32 = arith.constant 0 : i32
    %c0_i32_0 = arith.constant 0 : i32
    %c0_i32_1 = arith.constant 0 : i32
    return %c0_i32, %c0_i32_0 : i32, i32
  }
  func.func @transform_2(%arg0: i32) -> (i32, i32) {
    %c0_i32 = arith.constant 0 : i32
    %c0_i32_0 = arith.constant 0 : i32
    %c0_i32_1 = arith.constant 0 : i32
    return %c0_i32, %c0_i32_0 : i32, i32
  }
  func.func @transform_3(%arg0: i32) -> (i32, i32) {
    %c0_i32 = arith.constant 0 : i32
    %c0_i32_0 = arith.constant 0 : i32
    %c0_i32_1 = arith.constant 0 : i32
    return %c0_i32, %c0_i32_0 : i32, i32
  }
  func.func @transform_4(%arg0: i32) -> (i32, i32) {
    %c0_i32 = arith.constant 0 : i32
    %c0_i32_0 = arith.constant 0 : i32
    %c0_i32_1 = arith.constant 0 : i32
    return %c0_i32, %c0_i32_0 : i32, i32
  }
  func.func @transform_5(%arg0: i32) -> (i32, i32) {
    %c0_i32 = arith.constant 0 : i32
    %c0_i32_0 = arith.constant 0 : i32
    %c0_i32_1 = arith.constant 0 : i32
    return %c0_i32, %c0_i32_0 : i32, i32
  }
  func.func @transform_6(%arg0: i32) -> (i32, i32) {
    %c0_i32 = arith.constant 0 : i32
    %c0_i32_0 = arith.constant 0 : i32
    %c0_i32_1 = arith.constant 0 : i32
    return %c0_i32, %c0_i32_0 : i32, i32
  }
  func.func @transform_7(%arg0: i32) -> (i32, i32) {
    %c0_i32 = arith.constant 0 : i32
    %c0_i32_0 = arith.constant 0 : i32
    return %arg0, %c0_i32 : i32, i32
  }
}

</mosaic_0001>

<bundles_post_ra>
// kernel: actor_forward.1
= control target key start
LH: loop header
LB: loop body
LE: loop exit
PB: predicated region body
PF: predicated region fallthrough
CT: control target
= control target key end

     0   :  { %v1896_v1 = vmov 0   ;;  %vm1898_vm0 = vmmov 0   ;;  %s2436_s1 = inlined_call_operand.vmem [shape: bf16[128,512], index: 1, kind: input, shape index: {}]   ;;  %s2437_s3 = inlined_call_operand.vmem [shape: bf16[512,384], index: 3, kind: input, shape index: {}]   ;;  %s2438_s0 = inlined_call_operand.vmem [shape: f32[8,128], index: 0, kind: input, shape index: {}]   ;;  %s2439_s5 = inlined_call_operand.vmem [shape: bf16[384,128], index: 5, kind: input, shape index: {}]   ;;  %s2440_s2 = inlined_call_operand.vmem [shape: f32[1,512], index: 2, kind: input, shape index: {}]   ;;  %s2441_s4 = inlined_call_operand.vmem [shape: f32[1,384], index: 4, kind: input, shape index: {}]   ;;  %s2442_s6 = inlined_call_operand.vmem [shape: f32[1,128], index: 6, kind: input, shape index: {}]   ;;  %s2443_s7 = inlined_call_operand.vmem [shape: f32[8,128], index: 7, kind: output, shape index: {}]  }
   0x1   :  { %v1694_v0 = vld [vmem:[%s2436_s1 + $0xe4] ss:$16 sps:$4 sm:$0xff]   ;;  %275 = vmatprep.mubr.bf16.mxu0 %v1896_v1  ;;  %316 = vmatprep.mubr.bf16.mxu1 %v1896_v1  ;;  %v1696_v2 = vld [vmem:[%s2436_s1 + $0xec] ss:$16 sps:$4 sm:$0xff]   ;;  %v1698_v3 = vld [vmem:[%s2436_s1 + $0xe0] ss:$16 sps:$4 sm:$0xff]  }
   0x2   :  { %243 = vmatprep.subr.bf16.mxu0 %v1694_v0  ;;  %v1699_v4 = vld [vmem:[%s2436_s1 + $0xe8] ss:$16 sps:$4 sm:$0xff]   ;;  %284 = vmatprep.subr.bf16.mxu1 %v1696_v2  ;;  %v1700_v5 = vld [vmem:[%s2436_s1 + $0xc4] ss:$16 sps:$4 sm:$0xff]   ;;  %v1702_v6 = vld [vmem:[%s2436_s1 + $0xcc] ss:$16 sps:$4 sm:$0xff]  }
   0x3   :  { %244 = vmatpush1.bf16.msra.mxu0 %v1698_v3  ;;  %285 = vmatpush1.bf16.msra.mxu1 %v1699_v4  ;;  %v1704_v7 = vld [vmem:[%s2436_s1 + $0xc0] ss:$16 sps:$4 sm:$0xff]   ;;  %v1705_v8 = vld [vmem:[%s2436_s1 + $0xc8] ss:$16 sps:$4 sm:$0xff]   ;;  %v1706_v9 = vld [vmem:[%s2436_s1 + $0xa4] ss:$16 sps:$4 sm:$0xff]  }
   0x4   :  { %245 = vmatprep.subr.bf16.mxu0 %v1700_v5  ;;  %286 = vmatprep.subr.bf16.mxu1 %v1702_v6  ;;  %v1708_v10 = vld [vmem:[%s2436_s1 + $0xac] ss:$16 sps:$4 sm:$0xff]   ;;  %v1710_v11 = vld [vmem:[%s2436_s1 + $0xa0] ss:$16 sps:$4 sm:$0xff]   ;;  %v1711_v12 = vld [vmem:[%s2436_s1 + $0xa8] ss:$16 sps:$4 sm:$0xff]  }
   0x5   :  { %v1712_v13 = vld [vmem:[%s2436_s1 + $0x84] ss:$16 sps:$4 sm:$0xff]   ;;  %v1714_v14 = vld [vmem:[%s2436_s1 + $0x8c] ss:$16 sps:$4 sm:$0xff]   ;;  %v1716_v15 = vld [vmem:[%s2436_s1 + $0x80] ss:$16 sps:$4 sm:$0xff]  }
   0x6   :  { %v1717_v16 = vld [vmem:[%s2436_s1 + $0x88] ss:$16 sps:$4 sm:$0xff]   ;;  %v1718_v17 = vld [vmem:[%s2436_s1 + $0x64] ss:$16 sps:$4 sm:$0xff]   ;;  %v1720_v18 = vld [vmem:[%s2436_s1 + $0x6c] ss:$16 sps:$4 sm:$0xff]  }
   0x7   :  { %246 = vmatpush1.bf16.msra.mxu0 %v1704_v7  ;;  %287 = vmatpush1.bf16.msra.mxu1 %v1705_v8  ;;  %v1722_v19 = vld [vmem:[%s2436_s1 + $0x60] ss:$16 sps:$4 sm:$0xff]   ;;  %v1723_v20 = vld [vmem:[%s2436_s1 + $0x68] ss:$16 sps:$4 sm:$0xff]   ;;  %v1724_v21 = vld [vmem:[%s2436_s1 + $0x44] ss:$16 sps:$4 sm:$0xff]  }
   0x8   :  { %247 = vmatprep.subr.bf16.mxu0 %v1706_v9  ;;  %288 = vmatprep.subr.bf16.mxu1 %v1708_v10  ;;  %v1726_v22 = vld [vmem:[%s2436_s1 + $0x4c] ss:$16 sps:$4 sm:$0xff]   ;;  %v1728_v23 = vld [vmem:[%s2436_s1 + $0x40] ss:$16 sps:$4 sm:$0xff]   ;;  %v1729_v24 = vld [vmem:[%s2436_s1 + $0x48] ss:$16 sps:$4 sm:$0xff]  }
   0x9   :  { %v1730_v25 = vld [vmem:[%s2436_s1 + $0x24] ss:$16 sps:$4 sm:$0xff]   ;;  %v1732_v26 = vld [vmem:[%s2436_s1 + $0x2c] ss:$16 sps:$4 sm:$0xff]   ;;  %v1734_v27 = vld [vmem:[%s2436_s1 + $0x20] ss:$16 sps:$4 sm:$0xff]  }
   0xa   :  { %v1735_v28 = vld [vmem:[%s2436_s1 + $0x28] ss:$16 sps:$4 sm:$0xff]   ;;  %v1736_v29 = vld [vmem:[%s2436_s1 + $0x4] ss:$16 sps:$4 sm:$0xff]   ;;  %v1738_v30 = vld [vmem:[%s2436_s1 + $0xc] ss:$16 sps:$4 sm:$0xff]  }
   0xb   :  { %248 = vmatpush1.bf16.msra.mxu0 %v1710_v11  ;;  %289 = vmatpush1.bf16.msra.mxu1 %v1711_v12  ;;  %v1740_v31 = vld [vmem:[%s2436_s1] ss:$16 sps:$4 sm:$0xff]   ;;  %v1741_v32 = vld [vmem:[%s2436_s1 + $0x8] ss:$16 sps:$4 sm:$0xff]  }
   0xc   :  { %249 = vmatprep.subr.bf16.mxu0 %v1712_v13  ;;  %290 = vmatprep.subr.bf16.mxu1 %v1714_v14  ;;  %v27_v33 = vld [vmem:[%s2438_s0] sm:$0xff]  ;;  %v1744_v34 = vld [vmem:[%s2437_s3 + $0xac] ss:$12 sps:$4 sm:$0xff]   ;;  %v1742_v37 = vld [vmem:[%s2437_s3 + $0xa8] ss:$12 sps:$4 sm:$0xff]  }
   0xd   :  { %v1747_v35 = vld [vmem:[%s2437_s3 + $0x22c] ss:$12 sps:$4 sm:$0xff]   ;;  %v28_v36 = vpack.c.bf16 %v27_v33, %v27_v33  ;;  %v1745_v38 = vld [vmem:[%s2437_s3 + $0x228] ss:$12 sps:$4 sm:$0xff]   ;;  %v1748_v41 = vld [vmem:[%s2437_s3 + $0x90] ss:$12 sps:$4 sm:$0xff]  }
   0xe   :  { %v1750_v39 = vld [vmem:[%s2437_s3 + $0x94] ss:$12 sps:$4 sm:$0xff]   ;;  %v1751_v42 = vld [vmem:[%s2437_s3 + $0x210] ss:$12 sps:$4 sm:$0xff]   ;;  %v1754_v45 = vld [vmem:[%s2437_s3 + $0x78] ss:$12 sps:$4 sm:$0xff]  }
   0xf   :  { %250 = vmatpush1.bf16.msra.mxu0 %v1716_v15  ;;  %291 = vmatpush1.bf16.msra.mxu1 %v1717_v16  ;;  %v1753_v40 = vld [vmem:[%s2437_s3 + $0x214] ss:$12 sps:$4 sm:$0xff]   ;;  %v1756_v43 = vld [vmem:[%s2437_s3 + $0x7c] ss:$12 sps:$4 sm:$0xff]   ;;  %v1757_v46 = vld [vmem:[%s2437_s3 + $0x1f8] ss:$12 sps:$4 sm:$0xff]  }
  0x10   :  { %251 = vmatprep.subr.bf16.mxu0 %v1718_v17  ;;  %292 = vmatprep.subr.bf16.mxu1 %v1720_v18  ;;  %v1759_v44 = vld [vmem:[%s2437_s3 + $0x1fc] ss:$12 sps:$4 sm:$0xff]   ;;  %v1762_v47 = vld [vmem:[%s2437_s3 + $0x64] ss:$12 sps:$4 sm:$0xff]   ;;  %v1760_v49 = vld [vmem:[%s2437_s3 + $0x60] ss:$12 sps:$4 sm:$0xff]  }
  0x11   :  { %v1765_v48 = vld [vmem:[%s2437_s3 + $0x1e4] ss:$12 sps:$4 sm:$0xff]   ;;  %v1763_v50 = vld [vmem:[%s2437_s3 + $0x1e0] ss:$12 sps:$4 sm:$0xff]   ;;  %v1766_v53 = vld [vmem:[%s2437_s3 + $0x48] ss:$12 sps:$4 sm:$0xff]  }
  0x12   :  { %v1768_v51 = vld [vmem:[%s2437_s3 + $0x4c] ss:$12 sps:$4 sm:$0xff]   ;;  %v1769_v54 = vld [vmem:[%s2437_s3 + $0x1c8] ss:$12 sps:$4 sm:$0xff]   ;;  %v1772_v57 = vld [vmem:[%s2437_s3 + $0x30] ss:$12 sps:$4 sm:$0xff]  }
  0x13   :  { %252 = vmatpush1.bf16.msra.mxu0 %v1722_v19  ;;  %293 = vmatpush1.bf16.msra.mxu1 %v1723_v20  ;;  %v1771_v52 = vld [vmem:[%s2437_s3 + $0x1cc] ss:$12 sps:$4 sm:$0xff]   ;;  %v1774_v55 = vld [vmem:[%s2437_s3 + $0x34] ss:$12 sps:$4 sm:$0xff]   ;;  %v1775_v58 = vld [vmem:[%s2437_s3 + $0x1b0] ss:$12 sps:$4 sm:$0xff]  }
  0x14   :  { %253 = vmatprep.subr.bf16.mxu0 %v1724_v21  ;;  %294 = vmatprep.subr.bf16.mxu1 %v1726_v22  ;;  %v1777_v56 = vld [vmem:[%s2437_s3 + $0x1b4] ss:$12 sps:$4 sm:$0xff]   ;;  %v1780_v59 = vld [vmem:[%s2437_s3 + $0x1c] ss:$12 sps:$4 sm:$0xff]   ;;  %v1778_v61 = vld [vmem:[%s2437_s3 + $0x18] ss:$12 sps:$4 sm:$0xff]  }
  0x15   :  { %v1783_v60 = vld [vmem:[%s2437_s3 + $0x19c] ss:$12 sps:$4 sm:$0xff]   ;;  %v1781_v62 = vld [vmem:[%s2437_s3 + $0x198] ss:$12 sps:$4 sm:$0xff]   ;;  %v1784_v1 = vld [vmem:[%s2437_s3] ss:$12 sps:$4 sm:$0xff]  }
  0x16   :  { %v1786_v63 = vld [vmem:[%s2437_s3 + $0x4] ss:$12 sps:$4 sm:$0xff]   ;;  %v1787_v2 = vld [vmem:[%s2437_s3 + $0x180] ss:$12 sps:$4 sm:$0xff]   ;;  %v1790_v5 = vld [vmem:[%s2437_s3 + $0x168] ss:$12 sps:$4 sm:$0xff]  }
  0x17   :  { %254 = vmatpush1.bf16.msra.mxu0 %v1728_v23  ;;  %295 = vmatpush1.bf16.msra.mxu1 %v1729_v24  ;;  %v1789_v0 = vld [vmem:[%s2437_s3 + $0x184] ss:$12 sps:$4 sm:$0xff]   ;;  %v1792_v3 = vld [vmem:[%s2437_s3 + $0x16c] ss:$12 sps:$4 sm:$0xff]   ;;  %v1793_v6 = vld [vmem:[%s2437_s3 + $0x2e8] ss:$12 sps:$4 sm:$0xff]  }
  0x18   :  { %255 = vmatprep.subr.bf16.mxu0 %v1730_v25  ;;  %296 = vmatprep.subr.bf16.mxu1 %v1732_v26  ;;  %v1795_v4 = vld [vmem:[%s2437_s3 + $0x2ec] ss:$12 sps:$4 sm:$0xff]   ;;  %v1798_v7 = vld [vmem:[%s2437_s3 + $0x154] ss:$12 sps:$4 sm:$0xff]   ;;  %v1796_v9 = vld [vmem:[%s2437_s3 + $0x150] ss:$12 sps:$4 sm:$0xff]  }
  0x19   :  { %v1801_v8 = vld [vmem:[%s2437_s3 + $0x2d4] ss:$12 sps:$4 sm:$0xff]   ;;  %v1799_v10 = vld [vmem:[%s2437_s3 + $0x2d0] ss:$12 sps:$4 sm:$0xff]   ;;  %v1802_v13 = vld [vmem:[%s2437_s3 + $0x138] ss:$12 sps:$4 sm:$0xff]  }
  0x1a   :  { %v1804_v11 = vld [vmem:[%s2437_s3 + $0x13c] ss:$12 sps:$4 sm:$0xff]   ;;  %v1805_v14 = vld [vmem:[%s2437_s3 + $0x2b8] ss:$12 sps:$4 sm:$0xff]   ;;  %v1808_v17 = vld [vmem:[%s2437_s3 + $0x120] ss:$12 sps:$4 sm:$0xff]  }
  0x1b   :  { %256 = vmatpush1.bf16.msra.mxu0 %v1734_v27  ;;  %297 = vmatpush1.bf16.msra.mxu1 %v1735_v28  ;;  %v1807_v12 = vld [vmem:[%s2437_s3 + $0x2bc] ss:$12 sps:$4 sm:$0xff]   ;;  %v1810_v15 = vld [vmem:[%s2437_s3 + $0x124] ss:$12 sps:$4 sm:$0xff]   ;;  %v1811_v18 = vld [vmem:[%s2437_s3 + $0x2a0] ss:$12 sps:$4 sm:$0xff]  }
  0x1c   :  { %257 = vmatprep.subr.bf16.mxu0 %v1736_v29  ;;  %298 = vmatprep.subr.bf16.mxu1 %v1738_v30  ;;  %v1813_v16 = vld [vmem:[%s2437_s3 + $0x2a4] ss:$12 sps:$4 sm:$0xff]   ;;  %v1816_v19 = vld [vmem:[%s2437_s3 + $0x10c] ss:$12 sps:$4 sm:$0xff]   ;;  %v1814_v21 = vld [vmem:[%s2437_s3 + $0x108] ss:$12 sps:$4 sm:$0xff]  }
  0x1d   :  { %v1819_v20 = vld [vmem:[%s2437_s3 + $0x28c] ss:$12 sps:$4 sm:$0xff]   ;;  %v1817_v22 = vld [vmem:[%s2437_s3 + $0x288] ss:$12 sps:$4 sm:$0xff]   ;;  %v1820_v25 = vld [vmem:[%s2437_s3 + $0xf0] ss:$12 sps:$4 sm:$0xff]  }
  0x1e   :  { %v1822_v23 = vld [vmem:[%s2437_s3 + $0xf4] ss:$12 sps:$4 sm:$0xff]   ;;  %v1823_v26 = vld [vmem:[%s2437_s3 + $0x270] ss:$12 sps:$4 sm:$0xff]   ;;  %v1826_v29 = vld [vmem:[%s2437_s3 + $0xd8] ss:$12 sps:$4 sm:$0xff]  }
  0x1f   :  { %258 = vmatpush1.bf16.msra.mxu0 %v1740_v31  ;;  %299 = vmatpush1.bf16.msra.mxu1 %v1741_v32  ;;  %v1825_v24 = vld [vmem:[%s2437_s3 + $0x274] ss:$12 sps:$4 sm:$0xff]   ;;  %v1828_v27 = vld [vmem:[%s2437_s3 + $0xdc] ss:$12 sps:$4 sm:$0xff]   ;;  %v1829_v30 = vld [vmem:[%s2437_s3 + $0x258] ss:$12 sps:$4 sm:$0xff]  }
  0x20   :  { %990 = vmatprep.subr.bf16.mxu0 %v1744_v34  ;;  %1031 = vmatprep.subr.bf16.mxu1 %v1747_v35  ;;  %v1831_v28 = vld [vmem:[%s2437_s3 + $0x25c] ss:$12 sps:$4 sm:$0xff]   ;;  %v1834_v31 = vld [vmem:[%s2437_s3 + $0xc4] ss:$12 sps:$4 sm:$0xff]   ;;  %v1832_v33 = vld [vmem:[%s2437_s3 + $0xc0] ss:$12 sps:$4 sm:$0xff]  }
  0x21   :  { %v1837_v32 = vld [vmem:[%s2437_s3 + $0x244] ss:$12 sps:$4 sm:$0xff]   ;;  %v1835_v34 = vld [vmem:[%s2437_s3 + $0x240] ss:$12 sps:$4 sm:$0xff]  }
  0x22   :  { %276 = vmatmul.mubr.bf16.vlgmr.msra.gmra.mxu0 %v28_v36  ;;  %317 = vmatmul.mubr.bf16.vlgmr.msra.gmra.mxu1 %v28_v36  ;;  %v1838_v35 = vld [vmem:[%s2437_s3 + $0x170] ss:$12 sps:$4 sm:$0xff]  }
  0x23   :  { %991 = vmatpush1.bf16.msra.mxu0 %v1742_v37  ;;  %1032 = vmatpush1.bf16.msra.mxu1 %v1745_v38  ;;  %v1839_v36 = vld [vmem:[%s2437_s3 + $0x2f0] ss:$12 sps:$4 sm:$0xff]   ;;  %v63_v37 = vlaneseq }
  0x24   :  { %992 = vmatprep.subr.bf16.mxu0 %v1750_v39  ;;  %1033 = vmatprep.subr.bf16.mxu1 %v1753_v40 }
  0x25   :  { %v2236_v38 = vshrl.u32 %v63_v37, 7  ;;  %v1873_v37 = vld [vmem:[%s2439_s5 + $0x30] sm:$0xff]  }
  0x27   :  { %993 = vmatpush1.bf16.msra.mxu0 %v1748_v41  ;;  %1034 = vmatpush1.bf16.msra.mxu1 %v1751_v42  ;;  %v65_v39 = vsub.s32 0, %v2236_v38  ;;  %v73_v40 = vsub.s32 2, %v2236_v38  ;;  %v61_v41 = vld [vmem:[%s2440_s2] sm:$0xf]  ;;  %v69_v42 = vsub.s32 1, %v2236_v38 }
  0x28   :  { %994 = vmatprep.subr.bf16.mxu0 %v1756_v43  ;;  %1035 = vmatprep.subr.bf16.mxu1 %v1759_v44  ;;  %v77_v43 = vsub.s32 3, %v2236_v38  ;;  %v1571_v38 = vld [vmem:[%s2442_s6] ss:$0 sm:$0xff] }
  0x29   :  { %v66_v44 = vrot.slane %v61_v41, %v65_v39 }
  0x2b   :  { %995 = vmatpush1.bf16.msra.mxu0 %v1754_v45  ;;  %1036 = vmatpush1.bf16.msra.mxu1 %v1757_v46  ;;  %v74_v45 = vrot.slane %v61_v41, %v73_v40  ;;  %v70_v46 = vrot.slane %v61_v41, %v69_v42 }
  0x2c   :  { %996 = vmatprep.subr.bf16.mxu0 %v1762_v47  ;;  %1037 = vmatprep.subr.bf16.mxu1 %v1765_v48  ;;  %v78_v47 = vrot.slane %v61_v41, %v77_v43  ;;  %v1874_v41 = vld [vmem:[%s2439_s5 + $0x68] sm:$0xff]  }
  0x2d   :  { %v1875_v43 = vld [vmem:[%s2439_s5 + $0x28] sm:$0xff]  }
  0x2f   :  { %997 = vmatpush1.bf16.msra.mxu0 %v1760_v49  ;;  %1038 = vmatpush1.bf16.msra.mxu1 %v1763_v50 }
  0x30   :  { %998 = vmatprep.subr.bf16.mxu0 %v1768_v51  ;;  %1039 = vmatprep.subr.bf16.mxu1 %v1771_v52 }
  0x33   :  { %999 = vmatpush1.bf16.msra.mxu0 %v1766_v53  ;;  %1040 = vmatpush1.bf16.msra.mxu1 %v1769_v54 }
  0x34   :  { %1000 = vmatprep.subr.bf16.mxu0 %v1774_v55  ;;  %1041 = vmatprep.subr.bf16.mxu1 %v1777_v56 }
  0x37   :  { %1001 = vmatpush1.bf16.msra.mxu0 %v1772_v57  ;;  %1042 = vmatpush1.bf16.msra.mxu1 %v1775_v58 }
  0x38   :  { %1002 = vmatprep.subr.bf16.mxu0 %v1780_v59  ;;  %1043 = vmatprep.subr.bf16.mxu1 %v1783_v60 }
  0x3b   :  { %1003 = vmatpush1.bf16.msra.mxu0 %v1778_v61  ;;  %1044 = vmatpush1.bf16.msra.mxu1 %v1781_v62 }
  0x3c   :  { %1004 = vmatprep.subr.bf16.mxu0 %v1786_v63  ;;  %1045 = vmatprep.subr.bf16.mxu1 %v1789_v0 }
  0x3f   :  { %1005 = vmatpush1.bf16.msra.mxu0 %v1784_v1  ;;  %1046 = vmatpush1.bf16.msra.mxu1 %v1787_v2 }
  0x40   :  { %1006 = vmatprep.subr.bf16.mxu0 %v1792_v3  ;;  %1047 = vmatprep.subr.bf16.mxu1 %v1795_v4  ;;  %v1840_v3 = vld [vmem:[%s2437_s3 + $0xb0] ss:$12 sps:$4 sm:$0xff]  }
  0x41   :  { %v1841_v4 = vld [vmem:[%s2437_s3 + $0x230] ss:$12 sps:$4 sm:$0xff]  }
  0x43   :  { %1007 = vmatpush2.bf16.msra.mxu0 %v1790_v5  ;;  %1048 = vmatpush2.bf16.msra.mxu1 %v1793_v6  ;;  %v1842_v6 = vld [vmem:[%s2437_s3 + $0x158] ss:$12 sps:$4 sm:$0xff]  }
  0x44   :  { %1008 = vmatprep.subr.bf16.mxu0 %v1798_v7  ;;  %1049 = vmatprep.subr.bf16.mxu1 %v1801_v8  ;;  %v1843_v7 = vld [vmem:[%s2437_s3 + $0x2d8] ss:$12 sps:$4 sm:$0xff]  }
  0x45   :  { %v1844_v8 = vld [vmem:[%s2437_s3 + $0x98] ss:$12 sps:$4 sm:$0xff]  }
  0x47   :  { %1009 = vmatpush2.bf16.msra.mxu0 %v1796_v9  ;;  %1050 = vmatpush2.bf16.msra.mxu1 %v1799_v10  ;;  %v1845_v9 = vld [vmem:[%s2437_s3 + $0x218] ss:$12 sps:$4 sm:$0xff]   ;;  %v1846_v10 = vld [vmem:[%s2437_s3 + $0x140] ss:$12 sps:$4 sm:$0xff]  }
  0x48   :  { %1010 = vmatprep.subr.bf16.mxu0 %v1804_v11  ;;  %1051 = vmatprep.subr.bf16.mxu1 %v1807_v12  ;;  %v1847_v11 = vld [vmem:[%s2437_s3 + $0x2c0] ss:$12 sps:$4 sm:$0xff]  }
  0x49   :  { %v1848_v12 = vld [vmem:[%s2437_s3 + $0x80] ss:$12 sps:$4 sm:$0xff]  }
  0x4b   :  { %1011 = vmatpush2.bf16.msra.mxu0 %v1802_v13  ;;  %1052 = vmatpush2.bf16.msra.mxu1 %v1805_v14  ;;  %v1849_v13 = vld [vmem:[%s2437_s3 + $0x200] ss:$12 sps:$4 sm:$0xff]   ;;  %v1850_v14 = vld [vmem:[%s2437_s3 + $0x128] ss:$12 sps:$4 sm:$0xff]  }
  0x4c   :  { %1012 = vmatprep.subr.bf16.mxu0 %v1810_v15  ;;  %1053 = vmatprep.subr.bf16.mxu1 %v1813_v16  ;;  %v1851_v15 = vld [vmem:[%s2437_s3 + $0x2a8] ss:$12 sps:$4 sm:$0xff]  }
  0x4d   :  { %v1852_v16 = vld [vmem:[%s2437_s3 + $0x68] ss:$12 sps:$4 sm:$0xff]  }
  0x4f   :  { %1013 = vmatpush2.bf16.msra.mxu0 %v1808_v17  ;;  %1054 = vmatpush2.bf16.msra.mxu1 %v1811_v18  ;;  %v1853_v17 = vld [vmem:[%s2437_s3 + $0x1e8] ss:$12 sps:$4 sm:$0xff]   ;;  %v1854_v18 = vld [vmem:[%s2437_s3 + $0x110] ss:$12 sps:$4 sm:$0xff]  }
  0x50   :  { %1014 = vmatprep.subr.bf16.mxu0 %v1816_v19  ;;  %1055 = vmatprep.subr.bf16.mxu1 %v1819_v20  ;;  %v1855_v19 = vld [vmem:[%s2437_s3 + $0x290] ss:$12 sps:$4 sm:$0xff]  }
  0x51   :  { %v1856_v20 = vld [vmem:[%s2437_s3 + $0x50] ss:$12 sps:$4 sm:$0xff]  }
  0x53   :  { %1015 = vmatpush2.bf16.msra.mxu0 %v1814_v21  ;;  %1056 = vmatpush2.bf16.msra.mxu1 %v1817_v22  ;;  %v1857_v21 = vld [vmem:[%s2437_s3 + $0x1d0] ss:$12 sps:$4 sm:$0xff]   ;;  %v1858_v22 = vld [vmem:[%s2437_s3 + $0xf8] ss:$12 sps:$4 sm:$0xff]  }
  0x54   :  { %1016 = vmatprep.subr.bf16.mxu0 %v1822_v23  ;;  %1057 = vmatprep.subr.bf16.mxu1 %v1825_v24  ;;  %v1859_v23 = vld [vmem:[%s2437_s3 + $0x278] ss:$12 sps:$4 sm:$0xff]  }
  0x55   :  { %v1860_v24 = vld [vmem:[%s2437_s3 + $0x38] ss:$12 sps:$4 sm:$0xff]  }
  0x57   :  { %1017 = vmatpush2.bf16.msra.mxu0 %v1820_v25  ;;  %1058 = vmatpush2.bf16.msra.mxu1 %v1823_v26  ;;  %v1861_v25 = vld [vmem:[%s2437_s3 + $0x1b8] ss:$12 sps:$4 sm:$0xff]   ;;  %v1862_v26 = vld [vmem:[%s2437_s3 + $0xe0] ss:$12 sps:$4 sm:$0xff]  }
  0x58   :  { %1018 = vmatprep.subr.bf16.mxu0 %v1828_v27  ;;  %1059 = vmatprep.subr.bf16.mxu1 %v1831_v28  ;;  %v1863_v27 = vld [vmem:[%s2437_s3 + $0x260] ss:$12 sps:$4 sm:$0xff]  }
  0x59   :  { %v1864_v28 = vld [vmem:[%s2437_s3 + $0x20] ss:$12 sps:$4 sm:$0xff]  }
  0x5b   :  { %1019 = vmatpush2.bf16.msra.mxu0 %v1826_v29  ;;  %1060 = vmatpush2.bf16.msra.mxu1 %v1829_v30  ;;  %v1865_v29 = vld [vmem:[%s2437_s3 + $0x1a0] ss:$12 sps:$4 sm:$0xff]   ;;  %v1866_v30 = vld [vmem:[%s2437_s3 + $0xc8] ss:$12 sps:$4 sm:$0xff]  }
  0x5c   :  { %1020 = vmatprep.subr.bf16.mxu0 %v1834_v31  ;;  %1061 = vmatprep.subr.bf16.mxu1 %v1837_v32  ;;  %v1867_v31 = vld [vmem:[%s2437_s3 + $0x248] ss:$12 sps:$4 sm:$0xff]  }
  0x5d   :  { %v1868_v32 = vld [vmem:[%s2437_s3 + $0x8] ss:$12 sps:$4 sm:$0xff]  }
  0x5f   :  { %1021 = vmatpush2.bf16.msra.mxu0 %v1832_v33  ;;  %1062 = vmatpush2.bf16.msra.mxu1 %v1835_v34  ;;  %v1869_v33 = vld [vmem:[%s2437_s3 + $0x188] ss:$12 sps:$4 sm:$0xff]   ;;  %v1870_v34 = vld [vmem:[%s2439_s5 + $0x78] sm:$0xff]  }
  0x60   :  { %1596 = vmatprep.subr.bf16.mxu0 %v1838_v35  ;;  %1618 = vmatprep.subr.bf16.mxu1 %v1839_v36  ;;  %v1871_v35 = vld [vmem:[%s2439_s5 + $0x38] sm:$0xff]   ;;  %v1872_v36 = vld [vmem:[%s2439_s5 + $0x70] sm:$0xff]  }
  0xe2   :  { %v277_v48 = vpop.f32.mrf.mxu0  ;;  %v318_v49 = vpop.f32.mrf.mxu1 }
  0xe3   :  { %v278_v50 = vadd.f32 %v277_v48, %v66_v44  ;;  %v319_v51 = vadd.f32 %v318_v49, %v74_v45  ;;  %v1876_v44 = vld [vmem:[%s2439_s5 + $0x60] sm:$0xff]   ;;  %v1880_v48 = vld [vmem:[%s2439_s5 + $0x50] sm:$0xff]  }
  0xe4   :  { %v279_v52 = vpop.f32.mrf.mxu0  ;;  %v320_v53 = vpop.f32.mrf.mxu1  ;;  %v1877_v45 = vld [vmem:[%s2439_s5 + $0x20] sm:$0xff]   ;;  %v1881_v49 = vld [vmem:[%s2439_s5 + $0x10] sm:$0xff]  }
  0xe5   :  { %v327_v54 = vmax.f32 %v319_v51, 0.0  ;;  %v280_v55 = vadd.f32 %v279_v52, %v70_v46  ;;  %v321_v56 = vadd.f32 %v320_v53, %v78_v47  ;;  %v325_v57 = vmax.f32 %v278_v50, 0.0  ;;  %v1878_v46 = vld [vmem:[%s2439_s5 + $0x58] sm:$0xff]   ;;  %v1882_v50 = vld [vmem:[%s2439_s5 + $0x48] sm:$0xff]   ;;  %v1884_v52 = vld [vmem:[%s2439_s5 + $0x40] sm:$0xff]  }
  0xe6   :  { %v281_v58 = vpop.f32.mrf.mxu0  ;;  %v322_v59 = vpop.f32.mrf.mxu1  ;;  %v1879_v47 = vld [vmem:[%s2439_s5 + $0x18] sm:$0xff]   ;;  %v1883_v51 = vld [vmem:[%s2439_s5 + $0x8] sm:$0xff]   ;;  %v1885_v53 = vld [vmem:[%s2439_s5] sm:$0xff]  }
  0xe7   :  { %v326_v60 = vmax.f32 %v280_v55, 0.0  ;;  %v328_v61 = vmax.f32 %v321_v56, 0.0  ;;  %v2251_v62 = vpack.c.bf16 %v327_v54, %v327_v54  ;;  %v2259_v5 = vpack.c.bf16 %v325_v57, %v325_v57  ;;  %v1886_v54 = vld [vmem:[%s2439_s5 + $0xb8] sm:$0xff]   ;;  %v1887_v56 = vld [vmem:[%s2439_s5 + $0xb0] sm:$0xff]   ;;  %v1888_v57 = vld [vmem:[%s2439_s5 + $0xa8] sm:$0xff]  }
  0xe8   :  { %v282_v63 = vpop.f32.mrf.mxu0  ;;  %v323_v0 = vpop.f32.mrf.mxu1  ;;  %v1897_v55 = vmov 0.0   ;;  %v1889_v58 = vld [vmem:[%s2439_s5 + $0xa0] sm:$0xff]   ;;  %v1890_v59 = vld [vmem:[%s2439_s5 + $0x98] sm:$0xff]  }
  0xe9   :  { %v330_v1 = vpack.c.bf16 %v326_v60, %v326_v60  ;;  %v332_v2 = vpack.c.bf16 %v328_v61, %v328_v61  ;;  %v1891_v60 = vld [vmem:[%s2439_s5 + $0x90] sm:$0xff]   ;;  %v1892_v61 = vld [vmem:[%s2439_s5 + $0x88] sm:$0xff]   ;;  %v461_v63 = vld [vmem:[%s2441_s4] sm:$0x7] }
  0xea   :  { %v466_v0 = vrot.slane %v461_v63, %v65_v39 }
  0xeb   :  { %1022 = vmatprep.mubr.bf16.mxu0 %v330_v1  ;;  %1063 = vmatprep.mubr.bf16.mxu1 %v332_v2 }
  0xec   :  { %1023 = vmatmul.mubr.bf16.vlgmr.msra.gmra.mxu0 %v2259_v5  ;;  %1064 = vmatmul.mubr.bf16.vlgmr.msra.gmra.mxu1 %v2251_v62 }
  0xed   :  { %1597 = vmatpush3.bf16.msra.mxu0 %v1840_v3  ;;  %1619 = vmatpush3.bf16.msra.mxu1 %v1841_v4 }
  0xee   :  { %1104 = vmatprep.mubr.bf16.mxu0 %v330_v1  ;;  %1144 = vmatprep.mubr.bf16.mxu1 %v332_v2  ;;  %v470_v1 = vrot.slane %v461_v63, %v69_v42 }
  0xef   :  { %1598 = vmatprep.subr.bf16.mxu0 %v1842_v6  ;;  %1620 = vmatprep.subr.bf16.mxu1 %v1843_v7 }
  0xf1   :  { %1599 = vmatpush3.bf16.msra.mxu0 %v1844_v8  ;;  %1621 = vmatpush3.bf16.msra.mxu1 %v1845_v9 }
  0xf2   :  { %1600 = vmatprep.subr.bf16.mxu0 %v1846_v10  ;;  %1622 = vmatprep.subr.bf16.mxu1 %v1847_v11 }
  0xf5   :  { %1601 = vmatpush3.bf16.msra.mxu0 %v1848_v12  ;;  %1623 = vmatpush3.bf16.msra.mxu1 %v1849_v13 }
  0xf6   :  { %1602 = vmatprep.subr.bf16.mxu0 %v1850_v14  ;;  %1624 = vmatprep.subr.bf16.mxu1 %v1851_v15 }
  0xf9   :  { %1603 = vmatpush3.bf16.msra.mxu0 %v1852_v16  ;;  %1625 = vmatpush3.bf16.msra.mxu1 %v1853_v17 }
  0xfa   :  { %1604 = vmatprep.subr.bf16.mxu0 %v1854_v18  ;;  %1626 = vmatprep.subr.bf16.mxu1 %v1855_v19  ;;  %v474_v18 = vrot.slane %v461_v63, %v73_v40 }
  0xfd   :  { %1605 = vmatpush3.bf16.msra.mxu0 %v1856_v20  ;;  %1627 = vmatpush3.bf16.msra.mxu1 %v1857_v21 }
  0xfe   :  { %1606 = vmatprep.subr.bf16.mxu0 %v1858_v22  ;;  %1628 = vmatprep.subr.bf16.mxu1 %v1859_v23 }
 0x101   :  { %1607 = vmatpush3.bf16.msra.mxu0 %v1860_v24  ;;  %1629 = vmatpush3.bf16.msra.mxu1 %v1861_v25 }
 0x102   :  { %1608 = vmatprep.subr.bf16.mxu0 %v1862_v26  ;;  %1630 = vmatprep.subr.bf16.mxu1 %v1863_v27 }
 0x105   :  { %1609 = vmatpush3.bf16.msra.mxu0 %v1864_v28  ;;  %1631 = vmatpush3.bf16.msra.mxu1 %v1865_v29 }
 0x106   :  { %1610 = vmatprep.subr.bf16.mxu0 %v1866_v30  ;;  %1632 = vmatprep.subr.bf16.mxu1 %v1867_v31 }
 0x109   :  { %1611 = vmatpush3.bf16.msra.mxu0 %v1868_v32  ;;  %1633 = vmatpush3.bf16.msra.mxu1 %v1869_v33 }
 0x10a   :  { %1640 = vmatprep.subr.bf16.mxu0 %v1870_v34  ;;  %1671 = vmatprep.subr.bf16.mxu1 %v1897_v55 }
 0x10c   :  { %1105 = vmatmul.mubr.bf16.vlgmr.msra.gmra.mxu0 %v2259_v5  ;;  %1145 = vmatmul.mubr.bf16.vlgmr.msra.gmra.mxu1 %v2251_v62  ;;  %v1893_v62 = vld [vmem:[%s2439_s5 + $0x80] sm:$0xff]  }
 0x10d   :  { %1641 = vmatpush3.bf16.msra.mxu0 %v1871_v35  ;;  %1672 = vmatpush3.bf16.msra.mxu1 %v1886_v54 }
 0x10e   :  { %1642 = vmatprep.subr.bf16.mxu0 %v1872_v36  ;;  %1673 = vmatprep.subr.bf16.mxu1 %v1897_v55 }
 0x10f   :  { %1687 = vmatprep.mubr.msk.bf16.mxu1 %vm1898_vm0, %v1897_v55 }
 0x111   :  { %1643 = vmatpush3.bf16.msra.mxu0 %v1873_v37  ;;  %1674 = vmatpush3.bf16.msra.mxu1 %v1887_v56 }
 0x112   :  { %1644 = vmatprep.subr.bf16.mxu0 %v1874_v41  ;;  %1675 = vmatprep.subr.bf16.mxu1 %v1897_v55 }
 0x115   :  { %1645 = vmatpush3.bf16.msra.mxu0 %v1875_v43  ;;  %1676 = vmatpush3.bf16.msra.mxu1 %v1888_v57 }
 0x116   :  { %1646 = vmatprep.subr.bf16.mxu0 %v1876_v44  ;;  %1677 = vmatprep.subr.bf16.mxu1 %v1897_v55 }
 0x119   :  { %1647 = vmatpush3.bf16.msra.mxu0 %v1877_v45  ;;  %1678 = vmatpush3.bf16.msra.mxu1 %v1889_v58 }
 0x11a   :  { %1648 = vmatprep.subr.bf16.mxu0 %v1878_v46  ;;  %1679 = vmatprep.subr.bf16.mxu1 %v1897_v55 }
 0x11d   :  { %1649 = vmatpush3.bf16.msra.mxu0 %v1879_v47  ;;  %1680 = vmatpush3.bf16.msra.mxu1 %v1890_v59 }
 0x11e   :  { %1650 = vmatprep.subr.bf16.mxu0 %v1880_v48  ;;  %1681 = vmatprep.subr.bf16.mxu1 %v1897_v55 }
 0x121   :  { %1651 = vmatpush3.bf16.msra.mxu0 %v1881_v49  ;;  %1682 = vmatpush3.bf16.msra.mxu1 %v1891_v60 }
 0x122   :  { %1652 = vmatprep.subr.bf16.mxu0 %v1882_v50  ;;  %1683 = vmatprep.subr.bf16.mxu1 %v1897_v55 }
 0x125   :  { %1653 = vmatpush3.bf16.msra.mxu0 %v1883_v51  ;;  %1684 = vmatpush3.bf16.msra.mxu1 %v1892_v61 }
 0x126   :  { %1654 = vmatprep.subr.bf16.mxu0 %v1884_v52  ;;  %1685 = vmatprep.subr.bf16.mxu1 %v1897_v55 }
 0x129   :  { %1655 = vmatpush3.bf16.msra.mxu0 %v1885_v53  ;;  %1686 = vmatpush3.bf16.msra.mxu1 %v1893_v62 }
 0x1ac   :  { %v1024_v2 = vpop.f32.mrf.mxu0  ;;  %v1065_v3 = vpop.f32.mrf.mxu1 }
 0x1ad   :  { %v1025_v4 = vadd.f32 %v1024_v2, %v466_v0 }
 0x1ae   :  { %v1026_v5 = vpop.f32.mrf.mxu0  ;;  %v1067_v6 = vpop.f32.mrf.mxu1 }
 0x1af   :  { %v1066_v7 = vadd.f32 %v1065_v3, %v1025_v4  ;;  %v1027_v8 = vadd.f32 %v1026_v5, %v470_v1 }
 0x1b0   :  { %v1028_v9 = vpop.f32.mrf.mxu0  ;;  %v1069_v10 = vpop.f32.mrf.mxu1 }
 0x1b1   :  { %v1068_v11 = vadd.f32 %v1067_v6, %v1027_v8  ;;  %v1152_v12 = vmax.f32 %v1066_v7, 0.0 }
 0x1b2   :  { %v1029_v13 = vpop.f32.mrf.mxu0  ;;  %v1070_v14 = vpop.f32.mrf.mxu1 }
 0x1b3   :  { %v1153_v15 = vmax.f32 %v1068_v11, 0.0  ;;  %v1155_v17 = vpack.c.bf16 %v1152_v12, %v1152_v12 }
 0x1b5   :  { %v1156_v16 = vpack.c.bf16 %v1153_v15, %v1153_v15 }
 0x1b7   :  { %1389 = vmatprep.mubr.bf16.mxu0 %v1156_v16 }
 0x1b8   :  { %1390 = vmatmul.mubr.bf16.vlgmr.msra.gmra.mxu0 %v1155_v17 }
 0x1cc   :  { %v1612_v39 = vpop.f32.mrf.mxu0  ;;  %v1634_v42 = vpop.f32.mrf.mxu1 }
 0x1ce   :  { %v1613_v19 = vpop.f32.mrf.mxu0  ;;  %v1635_v20 = vpop.f32.mrf.mxu1 }
 0x1cf   :  { %v1614_v21 = vadd.f32 %v1613_v19, %v1612_v39  ;;  %v1636_v25 = vadd.f32 %v1635_v20, %v1634_v42 }
 0x1d0   :  { %v1615_v22 = vpop.f32.mrf.mxu0  ;;  %v1637_v23 = vpop.f32.mrf.mxu1 }
 0x1d1   :  { %v1107_v24 = vadd.f32 %v1614_v21, %v474_v18 }
 0x1d2   :  { %v1616_v26 = vpop.f32.mrf.mxu0  ;;  %v1638_v27 = vpop.f32.mrf.mxu1 }
 0x1d3   :  { %v1147_v28 = vadd.f32 %v1636_v25, %v1107_v24 }
 0x1d5   :  { %v1154_v29 = vmax.f32 %v1147_v28, 0.0 }
 0x1d7   :  { %v1157_v30 = vpack.c.bf16 %v1154_v29, %v1154_v29 }
 0x1d9   :  { %1688 = vmatmul.mubr.bf16.vlgmr.msra.gmra.mxu1 %v1157_v30 }
 0x278   :  { %v1656_v31 = vpop.f32.mrf.mxu0 }
 0x27a   :  { %v1657_v32 = vpop.f32.mrf.mxu0 }
 0x27b   :  { %v1658_v35 = vadd.f32 %v1657_v32, %v1656_v31 }
 0x27c   :  { %v1659_v33 = vpop.f32.mrf.mxu0 }
 0x27d   :  { %v1392_v40 = vadd.f32 %v1658_v35, %v1571_v38 }
 0x27e   :  { %v1660_v34 = vpop.f32.mrf.mxu0 }
 0x299   :  { %v1431_v36 = vpop.f32.mrf.mxu1 }
 0x29a   :  { %v1432_v37 = vadd.f32 %v1431_v36, %v1392_v40 }
 0x29b   :  { %v1689_v41 = vpop.f32.mrf.mxu1 }
 0x29c   :  { %1894 = vtanh.f32 %v1432_v37 }
 0x29d   :  { %v1434_v43 = vpop.f32.mrf.mxu1 }
 0x29f   :  { %v1690_v44 = vpop.f32.mrf.mxu1 }
 0x2a9   :  { %v1895_v45 = vpop.eup %1894 }
 0x2aa   :  { %1438 = vst [vmem:[%s2443_s7] sm:$0xff] %v1895_v45 }

</bundles_post_ra>
